<compile_context>
chip_gen: v7x
topology: tpu7x:2x2x1
jax: 0.10.0
libtpu: 0.0.40
codegen_flags: <defaults>
</compile_context>

<pallas_src>
import jax
import jax.numpy as jnp
from jax.experimental import pallas as pl
from jax.experimental.pallas import tpu as pltpu

MAX_BLOCK_BATCH = 2048   # rows per grid step cap (perf review: 2048-4096)


def _round_up(n, m):
    return ((n + m - 1) // m) * m


def eightball_mlp_kernel(x_ref, w1_ref, b1_ref, w2_ref, b2_ref, w3_ref, b3_ref, o_ref):
    # fc1 + ReLU: MXU matmul with f32 accumulation; bias-add / ReLU stay f32 on the VPU.
    x = x_ref[...].astype(w1_ref.dtype)
    h = jnp.dot(x, w1_ref[...], preferred_element_type=jnp.float32)
    h = jnp.maximum(h + b1_ref[...], 0.0)
    # fc2 + ReLU
    h = jnp.dot(h.astype(w2_ref.dtype), w2_ref[...], preferred_element_type=jnp.float32)
    h = jnp.maximum(h + b2_ref[...], 0.0)
    # fc3 (no activation)
    out = jnp.dot(h.astype(w3_ref.dtype), w3_ref[...], preferred_element_type=jnp.float32)
    o_ref[...] = (out + b3_ref[...]).astype(o_ref.dtype)


def init_params(key, input_size, hidden_size, hidden_size_2, output_size):
    """PyTorch nn.Linear-style uniform(-1/sqrt(fan_in)) init; weights stored as (in, out)."""
    ks = jax.random.split(key, 6)

    def linear(kw, kb, fan_in, fan_out):
        bound = 1.0 / (fan_in ** 0.5)
        w = jax.random.uniform(kw, (fan_in, fan_out), jnp.float32, -bound, bound)
        b = jax.random.uniform(kb, (1, fan_out), jnp.float32, -bound, bound)
        return w, b

    w1, b1 = linear(ks[0], ks[1], input_size, hidden_size)
    w2, b2 = linear(ks[2], ks[3], hidden_size, hidden_size_2)
    w3, b3 = linear(ks[4], ks[5], hidden_size_2, output_size)
    return {"w1": w1, "b1": b1, "w2": w2, "b2": b2, "w3": w3, "b3": b3}


def prepare_params(params, compute_dtype=jnp.float32):
    """Cast weights to the matmul compute dtype (bf16 is fine on v5e/v6e/v7x: the
    MXU is bf16-native and accumulation stays f32).  Biases stay f32 since they
    are added after the f32-accumulating matmul.  No padding is needed."""
    cdt = jnp.dtype(compute_dtype)
    return {
        "w1": params["w1"].astype(cdt), "b1": params["b1"].astype(jnp.float32),
        "w2": params["w2"].astype(cdt), "b2": params["b2"].astype(jnp.float32),
        "w3": params["w3"].astype(cdt), "b3": params["b3"].astype(jnp.float32),
    }


def _choose_block_batch(batch, sublane):
    b_al = _round_up(batch, sublane)
    if b_al <= MAX_BLOCK_BATCH:
        return b_al                       # single grid step -> no per-step overhead
    n_steps = pl.cdiv(b_al, MAX_BLOCK_BATCH)
    # TODO(synk): on v7x (2 TensorCores) round n_steps up to an even count so both
    # cores get equal work; on v5e/v6e (1 TC) extra steps are pure overhead.
    return _round_up(pl.cdiv(b_al, n_steps), sublane)


def eightball_forward(x, prepared, *, block_batch=None, vmem_limit_bytes=None,
                      cast_input=True):
    """x: (B, input_size).  Returns (B, output_size) float32."""
    w1, b1 = prepared["w1"], prepared["b1"]
    w2, b2 = prepared["w2"], prepared["b2"]
    w3, b3 = prepared["w3"], prepared["b3"]
    B, in_dim = x.shape
    assert in_dim == w1.shape[0], "x feature dim does not match params"
    h1, h2, out_dim = w1.shape[1], w2.shape[1], w3.shape[1]
    cdt = w1.dtype

    # Cast x to the compute dtype up front (halves the dominant x HBM stream on
    # the bf16 path).  With cast_input=False, x stays f32 in HBM and the kernel
    # casts per-tile in VMEM instead.
    if cast_input and x.dtype != cdt:
        x = x.astype(cdt)

    sublane = 16 if jnp.dtype(x.dtype).itemsize == 2 else 8
    if block_batch is None:
        block_batch = _choose_block_batch(B, sublane)
    assert block_batch % sublane == 0, "block_batch must be sublane-aligned"

    b_pad = _round_up(B, block_batch)
    grid = (b_pad // block_batch,)
    if b_pad != B:                        # rare: only when B is not tile-aligned
        x = jnp.pad(x, ((0, b_pad - B), (0, 0)))

    if vmem_limit_bytes is None:
        xb = jnp.dtype(x.dtype).itemsize
        wb = jnp.dtype(cdt).itemsize
        tile_bytes = (
            2 * block_batch * in_dim * xb                         # x tile (double-buffered)
            + 2 * block_batch * out_dim * 4                       # out tile (double-buffered)
            + 2 * (in_dim * h1 + h1 * h2 + h2 * out_dim) * wb     # weights (tiny)
            + 2 * (h1 + h2 + out_dim) * 4                         # biases
            + block_batch * (h1 + h2 + out_dim) * 4               # in-body f32 temporaries
        )
        # 2x headroom, floored at 16 MiB, capped at 48 MiB (safe on v5e..v7x).
        vmem_limit_bytes = int(min(max(2 * tile_bytes, 16 * 2**20), 48 * 2**20))

    flops = 2 * B * (in_dim * h1 + h1 * h2 + h2 * out_dim)
    bytes_accessed = (
        B * in_dim * jnp.dtype(x.dtype).itemsize
        + B * out_dim * 4
        + (in_dim * h1 + h1 * h2 + h2 * out_dim) * jnp.dtype(cdt).itemsize
        + (h1 + h2 + out_dim) * 4
    )
    cost = pl.CostEstimate(flops=flops, transcendentals=0,
                           bytes_accessed=bytes_accessed)

    const = lambda i: (0, 0)              # grid-invariant operands
    out_padded = pl.pallas_call(
        eightball_mlp_kernel,
        out_shape=jax.ShapeDtypeStruct((b_pad, out_dim), jnp.float32),
        grid_spec=pltpu.PrefetchScalarGridSpec(
            num_scalar_prefetch=0,
            grid=grid,
            in_specs=[
                pl.BlockSpec((block_batch, in_dim), lambda i: (i, 0)),  # x: tiled over batch only
                pl.BlockSpec((in_dim, h1), const),                      # w1 (full-array block)
                pl.BlockSpec((1, h1), const),                           # b1
                pl.BlockSpec((h1, h2), const),                          # w2
                pl.BlockSpec((1, h2), const),                           # b2
                pl.BlockSpec((h2, out_dim), const),                     # w3
                pl.BlockSpec((1, out_dim), const),                      # b3
            ],
            out_specs=pl.BlockSpec((block_batch, out_dim), lambda i: (i, 0)),
        ),
        compiler_params=pltpu.CompilerParams(
            dimension_semantics=("parallel",),
            vmem_limit_bytes=vmem_limit_bytes,
        ),
        cost_estimate=cost,
    )(x, w1, b1, w2, b2, w3, b3)

    return out_padded if b_pad == B else out_padded[:B]


def reference_forward(x, params):
    h = jnp.maximum(x @ params["w1"] + params["b1"], 0.0)
    h = jnp.maximum(h @ params["w2"] + params["b2"], 0.0)
    return h @ params["w3"] + params["b3"]


if __name__ == "__main__":
    # Shapes consistent with the module's constructor arguments.
    input_size, hidden_size, hidden_size_2, output_size = 32, 64, 32, 16

    key = jax.random.PRNGKey(0)
    k_x, k_x2, k_x3, k_p = jax.random.split(key, 4)
    params = init_params(k_p, input_size, hidden_size, hidden_size_2, output_size)

    # --- f32 compute path, aligned batch: zero wrapper passes, tight check ---
    batch = 8
    x = jax.random.normal(k_x, (batch, input_size), jnp.float32)
    prep_f32 = prepare_params(params, compute_dtype=jnp.float32)
    out = jax.block_until_ready(eightball_forward(x, prep_f32))
    ref = reference_forward(x, params)
    assert out.shape == (batch, output_size)
    assert jnp.allclose(out, ref, atol=1e-5, rtol=1e-5), "f32 mismatch vs reference"

    # --- bf16 weights + bf16 input cast (recommended on v5e/v6e/v7x), with a
    #     batch that is not sublane-aligned (padded internally to 16). ---
    batch2 = 10
    x2 = jax.random.normal(k_x2, (batch2, input_size), jnp.float32)
    prep_bf16 = prepare_params(params, compute_dtype=jnp.bfloat16)
    out2 = jax.block_until_ready(eightball_forward(x2, prep_bf16))
    ref2 = reference_forward(x2, params)
    assert out2.shape == (batch2, output_size)
    assert jnp.allclose(out2, ref2, atol=5e-2, rtol=5e-2), "bf16 mismatch vs reference"

    # --- multi-step grid path (explicit small block_batch) to exercise batch tiling ---
    batch3 = 24
    x3 = jax.random.normal(k_x3, (batch3, input_size), jnp.float32)
    out3 = jax.block_until_ready(eightball_forward(x3, prep_f32, block_batch=8))
    ref3 = reference_forward(x3, params)
    assert out3.shape == (batch3, output_size)
    assert jnp.allclose(out3, ref3, atol=1e-5, rtol=1e-5), "tiled-grid mismatch vs reference"

    print("KERNEL_OK")
</pallas_src>

<mosaic_0001>
module attributes {stable_mosaic.version = 11 : i64} {
  func.func @eightball_mlp_kernel(%arg0: i32, %arg1: memref<8x32xf32, #tpu.memory_space<vmem>>, %arg2: memref<32x64xf32, #tpu.memory_space<vmem>>, %arg3: memref<1x64xf32, #tpu.memory_space<vmem>>, %arg4: memref<64x32xf32, #tpu.memory_space<vmem>>, %arg5: memref<1x32xf32, #tpu.memory_space<vmem>>, %arg6: memref<32x16xf32, #tpu.memory_space<vmem>>, %arg7: memref<1x16xf32, #tpu.memory_space<vmem>>, %arg8: memref<8x16xf32, #tpu.memory_space<vmem>>) attributes {dimension_semantics = [#tpu.dimension_semantics<parallel>], iteration_bounds = array<i64: 1>, scalar_prefetch = 0 : i64, scratch_operands = 0 : i64, tpu.core_type = #tpu.core_type<tc>, window_params = [{transform_indices = @transform_0, window_bounds = array<i64: 8, 32>}, {pipeline_mode = #tpu.pipeline_mode<synchronous>, transform_indices = @transform_1, window_bounds = array<i64: 32, 64>}, {pipeline_mode = #tpu.pipeline_mode<synchronous>, transform_indices = @transform_2, window_bounds = array<i64: 1, 64>}, {pipeline_mode = #tpu.pipeline_mode<synchronous>, transform_indices = @transform_3, window_bounds = array<i64: 64, 32>}, {pipeline_mode = #tpu.pipeline_mode<synchronous>, transform_indices = @transform_4, window_bounds = array<i64: 1, 32>}, {pipeline_mode = #tpu.pipeline_mode<synchronous>, transform_indices = @transform_5, window_bounds = array<i64: 32, 16>}, {pipeline_mode = #tpu.pipeline_mode<synchronous>, transform_indices = @transform_6, window_bounds = array<i64: 1, 16>}, {transform_indices = @transform_7, window_bounds = array<i64: 8, 16>}]} {
    %c0 = arith.constant 0 : index
    %c0_0 = arith.constant 0 : index
    %0 = vector.load %arg1[%c0, %c0_0] : memref<8x32xf32, #tpu.memory_space<vmem>>, vector<8x32xf32>
    %c0_1 = arith.constant 0 : index
    %c0_2 = arith.constant 0 : index
    %1 = vector.load %arg2[%c0_1, %c0_2] : memref<32x64xf32, #tpu.memory_space<vmem>>, vector<32x64xf32>
    %cst = arith.constant dense<0.000000e+00> : vector<8x64xf32>
    %2 = tpu.matmul %0, %1, %cst {dimension_numbers = #tpu.dot_dimension_numbers<[1], [0], [0], [1], [0, 0, 1, 1], [], []>} : vector<8x32xf32>, vector<32x64xf32>, vector<8x64xf32> -> vector<8x64xf32>
    %c0_3 = arith.constant 0 : index
    %c0_4 = arith.constant 0 : index
    %3 = vector.load %arg3[%c0_3, %c0_4] : memref<1x64xf32, #tpu.memory_space<vmem>>, vector<1x64xf32>
    %4 = vector.broadcast %3 : vector<1x64xf32> to vector<8x64xf32>
    %5 = arith.addf %2, %4 : vector<8x64xf32>
    %cst_5 = arith.constant 0.000000e+00 : f32
    %6 = vector.broadcast %cst_5 : f32 to vector<8x64xf32>
    %7 = arith.maximumf %5, %6 : vector<8x64xf32>
    %c0_6 = arith.constant 0 : index
    %c0_7 = arith.constant 0 : index
    %8 = vector.load %arg4[%c0_6, %c0_7] : memref<64x32xf32, #tpu.memory_space<vmem>>, vector<64x32xf32>
    %cst_8 = arith.constant dense<0.000000e+00> : vector<8x32xf32>
    %9 = tpu.matmul %7, %8, %cst_8 {dimension_numbers = #tpu.dot_dimension_numbers<[1], [0], [0], [1], [0, 0, 1, 1], [], []>} : vector<8x64xf32>, vector<64x32xf32>, vector<8x32xf32> -> vector<8x32xf32>
    %c0_9 = arith.constant 0 : index
    %c0_10 = arith.constant 0 : index
    %10 = vector.load %arg5[%c0_9, %c0_10] : memref<1x32xf32, #tpu.memory_space<vmem>>, vector<1x32xf32>
    %11 = vector.broadcast %10 : vector<1x32xf32> to vector<8x32xf32>
    %12 = arith.addf %9, %11 : vector<8x32xf32>
    %cst_11 = arith.constant 0.000000e+00 : f32
    %13 = vector.broadcast %cst_11 : f32 to vector<8x32xf32>
    %14 = arith.maximumf %12, %13 : vector<8x32xf32>
    %c0_12 = arith.constant 0 : index
    %c0_13 = arith.constant 0 : index
    %15 = vector.load %arg6[%c0_12, %c0_13] : memref<32x16xf32, #tpu.memory_space<vmem>>, vector<32x16xf32>
    %cst_14 = arith.constant dense<0.000000e+00> : vector<8x16xf32>
    %16 = tpu.matmul %14, %15, %cst_14 {dimension_numbers = #tpu.dot_dimension_numbers<[1], [0], [0], [1], [0, 0, 1, 1], [], []>} : vector<8x32xf32>, vector<32x16xf32>, vector<8x16xf32> -> vector<8x16xf32>
    %c0_15 = arith.constant 0 : index
    %c0_16 = arith.constant 0 : index
    %17 = vector.load %arg7[%c0_15, %c0_16] : memref<1x16xf32, #tpu.memory_space<vmem>>, vector<1x16xf32>
    %18 = vector.broadcast %17 : vector<1x16xf32> to vector<8x16xf32>
    %19 = arith.addf %16, %18 : vector<8x16xf32>
    %c0_17 = arith.constant 0 : index
    %c0_18 = arith.constant 0 : index
    %20 = vector.load %arg8[%c0_17, %c0_18] : memref<8x16xf32, #tpu.memory_space<vmem>>, vector<8x16xf32>
    tpu.vector_store %arg8[%c0_17, %c0_18], %19 {strides = array<i32>} : memref<8x16xf32, #tpu.memory_space<vmem>>, vector<8x16xf32>,
    return
  }
  func.func @transform_0(%arg0: i32) -> (i32, i32) {
    %c0_i32 = arith.constant 0 : i32
    %c0_i32_0 = arith.constant 0 : i32
    return %arg0, %c0_i32 : i32, i32
  }
  func.func @transform_1(%arg0: i32) -> (i32, i32) {
    %c0_i32 = arith.constant 0 : i32
    %c0_i32_0 = arith.constant 0 : i32
    %c0_i32_1 = arith.constant 0 : i32
    return %c0_i32, %c0_i32_0 : i32, i32
  }
  func.func @transform_2(%arg0: i32) -> (i32, i32) {
    %c0_i32 = arith.constant 0 : i32
    %c0_i32_0 = arith.constant 0 : i32
    %c0_i32_1 = arith.constant 0 : i32
    return %c0_i32, %c0_i32_0 : i32, i32
  }
  func.func @transform_3(%arg0: i32) -> (i32, i32) {
    %c0_i32 = arith.constant 0 : i32
    %c0_i32_0 = arith.constant 0 : i32
    %c0_i32_1 = arith.constant 0 : i32
    return %c0_i32, %c0_i32_0 : i32, i32
  }
  func.func @transform_4(%arg0: i32) -> (i32, i32) {
    %c0_i32 = arith.constant 0 : i32
    %c0_i32_0 = arith.constant 0 : i32
    %c0_i32_1 = arith.constant 0 : i32
    return %c0_i32, %c0_i32_0 : i32, i32
  }
  func.func @transform_5(%arg0: i32) -> (i32, i32) {
    %c0_i32 = arith.constant 0 : i32
    %c0_i32_0 = arith.constant 0 : i32
    %c0_i32_1 = arith.constant 0 : i32
    return %c0_i32, %c0_i32_0 : i32, i32
  }
  func.func @transform_6(%arg0: i32) -> (i32, i32) {
    %c0_i32 = arith.constant 0 : i32
    %c0_i32_0 = arith.constant 0 : i32
    %c0_i32_1 = arith.constant 0 : i32
    return %c0_i32, %c0_i32_0 : i32, i32
  }
  func.func @transform_7(%arg0: i32) -> (i32, i32) {
    %c0_i32 = arith.constant 0 : i32
    %c0_i32_0 = arith.constant 0 : i32
    return %arg0, %c0_i32 : i32, i32
  }
}

</mosaic_0001>

<bundles_post_ra>
// kernel: tpu_custom_call.1
= control target key start
LH: loop header
LB: loop body
LE: loop exit
PB: predicated region body
PF: predicated region fallthrough
CT: control target
= control target key end

     0   :  { %v422_v3 = vmov 0.0|0.0   ;;  %vm423_vm0 = vmmov 0   ;;  %v424_v6 = vmov 0.0   ;;  %s543_s0 = inlined_call_operand.vmem [shape: f32[8,32], index: 0, kind: input, shape index: {}]   ;;  %s544_s1 = inlined_call_operand.vmem [shape: f32[32,64], index: 1, kind: input, shape index: {}]   ;;  %s545_s2 = inlined_call_operand.vmem [shape: f32[1,64], index: 2, kind: input, shape index: {}]   ;;  %s546_s3 = inlined_call_operand.vmem [shape: f32[64,32], index: 3, kind: input, shape index: {}]   ;;  %s547_s4 = inlined_call_operand.vmem [shape: f32[1,32], index: 4, kind: input, shape index: {}]   ;;  %s548_s5 = inlined_call_operand.vmem [shape: f32[32,16], index: 5, kind: input, shape index: {}]   ;;  %s549_s6 = inlined_call_operand.vmem [shape: f32[1,16], index: 6, kind: input, shape index: {}]   ;;  %s550_s7 = inlined_call_operand.hbm [shape: f32[8,16], index: 7, kind: output, shape index: {}]  }
   0x1   :  { %v28_v0 = vld [vmem:[%s544_s1] sm:$0xff]  ;;  %v29_v1 = vld [vmem:[%s544_s1 + $0x8] sm:$0xff]  ;;  %v30_v2 = vld [vmem:[%s544_s1 + $0x10] sm:$0xff]  ;;  %370 = vmatprep.subr.bf16.mxu0 %v422_v3  ;;  %337 = vmatprep.mubr.msk.f32.mxu0 %vm423_vm0, %v424_v6 }
   0x2   :  { %v371_v4 = vpack.c.bf16 %v29_v1, %v28_v0  ;;  %v31_v5 = vld [vmem:[%s544_s1 + $0x18] sm:$0xff]  ;;  %v114_v7 = vld [vmem:[%s546_s3] sm:$0xff]  ;;  %376 = vmatprep.subr.bf16.mxu1 %v422_v3  ;;  %v115_v8 = vld [vmem:[%s546_s3 + $0x8] sm:$0xff]  ;;  %356 = vmatprep.mubr.msk.f32.mxu1 %vm423_vm0, %v424_v6 }
   0x3   :  { %v116_v9 = vld [vmem:[%s546_s3 + $0x10] sm:$0xff]  ;;  %v117_v10 = vld [vmem:[%s546_s3 + $0x18] sm:$0xff]  ;;  %v374_v11 = vpack.c.bf16 %v31_v5, %v30_v2  ;;  %v377_v12 = vpack.c.bf16 %v115_v8, %v114_v7 }
   0x4   :  { %372 = vmatpush3.bf16.msra.mxu0 %v371_v4 }
   0x5   :  { %373 = vmatprep.subr.bf16.mxu0 %v422_v3 }
   0x6   :  { %12 = vsyncpa [#allocation3], 0  ;;  %378 = vmatpush3.bf16.msra.mxu1 %v377_v12  ;;  %v380_v13 = vpack.c.bf16 %v117_v10, %v116_v9  ;;  %v118_v14 = vld [vmem:[%s546_s3 + $0x20] sm:$0xff]  ;;  %v119_v15 = vld [vmem:[%s546_s3 + $0x28] sm:$0xff]  ;;  %vm39_vm1 = vcmask 261120   ;;  %vm129_vm2 = vcmask 523264  }
   0x7   :  { %379 = vmatprep.subr.bf16.mxu1 %v422_v3  ;;  %v27_v16 = vld [vmem:[%s543_s0] sm:$0xff]  ;;  %v383_v17 = vpack.c.bf16 %v119_v15, %v118_v14  ;;  %v120_v18 = vld [vmem:[%s546_s3 + $0x30] sm:$0xff]  ;;  %v121_v19 = vld [vmem:[%s546_s3 + $0x38] sm:$0xff]  ;;  %s425_s14 = smov [#allocation2]   ;;  %vm288_vm3 = vcmask 130048  }
   0x8   :  { %375 = vmatpush3.bf16.msra.mxu0 %v374_v11  ;;  %v386_v20 = vpack.c.bf16 %v121_v19, %v120_v18  ;;  %v204_v21 = vld [vmem:[%s548_s5] sm:$0xff]  ;;  %v205_v22 = vld [vmem:[%s548_s5 + $0x8] sm:$0xff]  ;;  %v206_v29 = vld [vmem:[%s548_s5 + $0x10] sm:$0xff]  ;;  %s296_s15 = sshll.u32 %s425_s14, 4  ;;  %s297_s15 = int_to_ptr.vmem [resolvable:$true] %s296_s15 }
   0x9   :  { %388 = vmatprep.subr.bf16.mxu0 %v422_v3  ;;  %v389_v23 = vpack.c.bf16 %v205_v22, %v204_v21  ;;  %v304_v24 = vld [vmem:[%s545_s2] ss:$0 sm:$0xff]  ;;  %v207_v30 = vld [vmem:[%s548_s5 + $0x18] sm:$0xff]  ;;  %s398_s5 = scalar_lea.vmem %s297_s15, 128  ;;  %p403_p1 = scmp.lt.s32.totalorder %s297_s15, %s297_s15 }
   0xa   :  { %381 = vmatpush3.bf16.msra.mxu1 %v380_v13  ;;  %v392_v31 = vpack.c.bf16 %v207_v30, %v206_v29  ;;  %v306_v32 = vld [vmem:[%s547_s4] ss:$0 sm:$0xff]  ;;  %p399_p0 = scmp.ne.s32.totalorder %s297_s15, %s398_s5  ;;  %p404_p2 = scmp.lt.s32.totalorder %s398_s5, %s398_s5 }
   0xb   :  { %338 = vmatmul.mubr.msk.f32.vlgmr.msra.gmra.mrb[0].mxu0 %vm39_vm1, %v27_v16  ;;  %382 = vmatprep.subr.bf16.mxu1 %v422_v3  ;;  %v308_v37 = vld [vmem:[%s549_s6] ss:$0 sm:$0xff] }
   0xc   :  { %367 = vmatprep.mubr.msk.f32.mxu0 %vm423_vm0, %v424_v6  ;;  %390 = vmatpush3.bf16.msra.mxu0 %v389_v23  ;;  %p405_p3 = por %p404_p2, %p403_p1 }
   0xd   :  { %391 = vmatprep.subr.bf16.mxu0 %v422_v3 }
   0xe   :  { %384 = vmatpush3.bf16.msra.mxu1 %v383_v17  ;;  %p406_p4 = pnand %p405_p3, %p399_p0 }
   0xf   :  { %385 = vmatprep.subr.bf16.mxu1 %v422_v3 }
  0x10   :  { %393 = vmatpush3.bf16.msra.mxu0 %v392_v31 }
  0x12   :  { %387 = vmatpush3.bf16.msra.mxu1 %v386_v20 }
  0xde   :  { %v109_v25 = vpop.f32.mrb[0].mxu0 }
  0xdf   :  { %v110_v26 = vadd.f32 %v304_v24, %v109_v25  ;;  %v339_v27 = vpop.f32.mrb[1].mxu0 }
  0xe1   :  { %v113_v28 = vmax.f32 %v110_v26, 0.0 }
  0xe3   :  { %357 = vmatmul.mubr.msk.f32.vlgmr.msra.gmra.mrb[0].mxu1 %vm129_vm2, %v113_v28 }
 0x1b6   :  { %v199_v33 = vpop.f32.mrb[0].mxu1 }
 0x1b7   :  { %v200_v34 = vadd.f32 %v306_v32, %v199_v33  ;;  %v358_v35 = vpop.f32.mrb[1].mxu1 }
 0x1b9   :  { %v203_v36 = vmax.f32 %v200_v34, 0.0 }
 0x1bb   :  { %368 = vmatmul.mubr.msk.f32.vlgmr.msra.gmra.mrb[2].mxu0 %vm39_vm1, %v203_v36 }
 0x28e   :  { %v284_v38 = vpop.f32.mrb[2].mxu0 }
 0x28f   :  { %v285_v39 = vadd.f32 %v308_v37, %v284_v38  ;;  %v369_v40 = vpop.f32.mrb[3].mxu0 }
 0x291   :  { %289 = vst.msk [vmem:[#allocation2] sm:$0xff] %vm288_vm3, %v285_v39 }
 0x292   :  { %409 = shalt.err (!%p406_p4)
}
 0x293   :  { %s410_s1 = scalar_lea.hbm %s550_s7, 128 }
 0x294   :  { %p411_p5 = scmp.ne.s32.totalorder %s550_s7, %s410_s1  ;;  %p414_p6 = scmp.lt.u32.totalorder %s410_s1, %s550_s7 }
 0x296   :  { %p416_p7 = pnand %p414_p6, %p411_p5 }
 0x298   :  { %419 = shalt.err (!%p416_p7)
}
 0x299   :  { %299 = dma.vmem_to_hbm [thread:$0]  %s297_s15, 128, %s550_s7, [#allocation3]  }
 0x29a   :  { %420 = dma.done.wait [#allocation3], 128  }
 0x29b   :  { %421 = vsyncadd [#allocation3], 4294967168 }
 0x29c   :  { %303 = vsyncpa [#allocation3], 1 }

</bundles_post_ra>
